<compile_context>
chip_gen: v6e
topology: v6e:2x2x1
jax: 0.10.0
libtpu: 0.0.40
codegen_flags: <defaults>
</compile_context>

<pallas_src>
import functools

import jax
import jax.numpy as jnp
from jax.experimental import pallas as pl
from jax.experimental.pallas import tpu as pltpu


def _embed_gather_kernel(ids_ref, table_ref, out_ref, sem, *, tokens_per_step):
    """Gather `tokens_per_step` embedding rows into one dense (T, H) tile.

    ids_ref:   (N,) int32 token ids, scalar-prefetched into SMEM.
    table_ref: (V, H) embedding table.  Either a raw HBM ref (pl.ANY, large
               vocab) or a VMEM-resident block (small vocab).  The body is
               identical for both: per-row async copies into the output tile.
    out_ref:   (T, H) VMEM output tile for this grid step.
    sem:       single DMA semaphore; every row copy signals it and one
               aggregate wait per step retires them all.
    """
    T = tokens_per_step
    base = pl.multiple_of(pl.program_id(0) * T, T)

    # Issue all T row-gather DMAs back to back.  T is a static Python int, so
    # this is fully unrolled straight-line code: per row it is one SMEM id
    # load + one DMA descriptor, with no waits, no rem/slot math in between.
    for t in range(T):
        row = ids_ref[base + t]                       # SMEM scalar load
        pltpu.make_async_copy(
            table_ref.at[pl.ds(row, 1), :],           # (1, H) table row
            out_ref.at[pl.ds(t, 1), :],               # (1, H) output row
            sem,
        ).start()

    # One aggregate wait: DMA semaphores count bytes, and T x (1, H) row
    # copies sum to exactly one (T, H) tile, so a single (T, H)-sized wait
    # retires every outstanding copy of this step before the pipeline writes
    # the tile back to HBM.
    pltpu.make_async_copy(out_ref, out_ref, sem).wait()


def _pick_tokens_per_step(n_tokens, cap):
    """Largest T <= cap with T % 8 == 0 and T dividing n_tokens (else None)."""
    best = None
    t = 8
    limit = min(cap, n_tokens)
    while t <= limit:
        if n_tokens % t == 0:
            best = t
        t += 8
    return best


def gpt_embeddings_forward(input_ids, embed_table, *,
                           tokens_per_step=128,
                           vmem_table_bytes=4 << 20,
                           force_hbm_table=False):
    """Equivalent of GPTEmbeddings.forward: embed_tokens(input_ids)."""
    B, S = input_ids.shape
    V, H = embed_table.shape
    itemsize = jnp.dtype(embed_table.dtype).itemsize
    N = B * S
    flat_ids = input_ids.reshape(-1).astype(jnp.int32)

    # ---- Token tile T: multiple of 8 that divides N -> no padding, no
    #      post-kernel slice copy, no wasted gather DMAs.
    T = _pick_tokens_per_step(N, tokens_per_step)
    pad = 0
    if T is None:
        if N <= max(tokens_per_step, 8):
            T = N                                     # full-extent block
        else:
            # Rare fallback (N not a multiple of 8 and too large for one
            # step): pad with token 0 and slice afterwards.
            # TODO(synk): guard tail rows with pl.when instead of padding.
            pad = (-N) % 8
            flat_ids = jnp.pad(flat_ids, (0, pad))
            T = _pick_tokens_per_step(N + pad, tokens_per_step) or (N + pad)
    n_tok = N + pad
    n_steps = n_tok // T

    # ---- Table placement: small tables live in VMEM (row copies become
    #      cheap on-chip DMAs, fetched once thanks to the constant index
    #      map); large tables stay in HBM and are gathered row by row.
    table_in_vmem = (not force_hbm_table) and (V * H * itemsize <= vmem_table_bytes)
    if table_in_vmem:
        table_spec = pl.BlockSpec((V, H), lambda i, ids: (0, 0))
    else:
        table_spec = pl.BlockSpec(memory_space=pl.ANY)

    # ---- VMEM budget: double-buffered (T, H) output tile (+ resident table
    #      on the fast path) + headroom.  Keeps defaults within v7x's 64 MiB.
    needed = 2 * T * H * itemsize
    if table_in_vmem:
        needed += 2 * V * H * itemsize
    needed += 1 << 20
    compiler_params = pltpu.CompilerParams(
        dimension_semantics=("parallel",),            # token blocks independent
        vmem_limit_bytes=int(max(needed, 32 << 20)),
    )

    kernel = functools.partial(_embed_gather_kernel, tokens_per_step=T)

    out_flat = pl.pallas_call(
        kernel,
        out_shape=jax.ShapeDtypeStruct((n_tok, H), embed_table.dtype),
        grid_spec=pltpu.PrefetchScalarGridSpec(
            num_scalar_prefetch=1,                    # flat_ids -> SMEM
            grid=(n_steps,),
            in_specs=[table_spec],
            out_specs=pl.BlockSpec((T, H), lambda i, ids: (i, 0)),
            scratch_shapes=[pltpu.SemaphoreType.DMA], # one shared DMA sem
        ),
        compiler_params=compiler_params,
    )(flat_ids, embed_table)

    if pad:
        out_flat = out_flat[:N]
    return out_flat.reshape(B, S, H)


def init_embed_table(key, vocab_size, hidden_size, padding_idx,
                     dtype=jnp.float32):
    # nn.Embedding default init: N(0, 1); padding_idx row zeroed.
    w = jax.random.normal(key, (vocab_size, hidden_size), dtype=dtype)
    if padding_idx is not None:
        w = w.at[padding_idx].set(0.0)
    return w


if __name__ == "__main__":
    # Small synthetic "config".  Hidden size is a multiple of 128 so output
    # tiles are lane-dense (real GPT hidden sizes already satisfy this).
    vocab_size = 64
    hidden_size = 128
    pad_token_id = 0
    B, S = 2, 16

    key = jax.random.PRNGKey(0)
    k_w, k_ids = jax.random.split(key)

    embed_table = init_embed_table(k_w, vocab_size, hidden_size, pad_token_id)
    input_ids = jax.random.randint(k_ids, (B, S), 0, vocab_size, dtype=jnp.int32)
    input_ids = input_ids.at[0, 0].set(pad_token_id)  # exercise padding row

    ref = jnp.take(embed_table, input_ids, axis=0)

    # Small tokens_per_step so the demo exercises several grid steps;
    # production defaults (tokens_per_step=128) amortize per-step overhead.

    # 1) Small-table fast path: table resident in VMEM.
    out_vmem = gpt_embeddings_forward(input_ids, embed_table, tokens_per_step=8)
    out_vmem = jax.block_until_ready(out_vmem)
    assert out_vmem.shape == (B, S, hidden_size)
    assert bool(jnp.array_equal(out_vmem, ref)), "VMEM-table path mismatch"

    # 2) Large-vocab path: table stays in HBM, rows gathered by manual DMA.
    out_hbm = gpt_embeddings_forward(input_ids, embed_table, tokens_per_step=8,
                                     force_hbm_table=True)
    out_hbm = jax.block_until_ready(out_hbm)
    assert bool(jnp.array_equal(out_hbm, ref)), "HBM-gather path mismatch"

    print("KERNEL_OK")
</pallas_src>

<mosaic_0001>
module attributes {stable_mosaic.version = 11 : i64} {
  func.func @_embed_gather_kernel(%arg0: i32, %arg1: memref<32xi32, #tpu.memory_space<smem>>, %arg2: memref<64x128xf32, #tpu.memory_space<vmem>>, %arg3: memref<8x128xf32, #tpu.memory_space<vmem>>, %arg4: memref<!tpu.dma_semaphore, #tpu.memory_space<semaphore_mem>>) attributes {dimension_semantics = [#tpu.dimension_semantics<parallel>], iteration_bounds = array<i64: 4>, scalar_prefetch = 1 : i64, scratch_operands = 1 : i64, tpu.core_type = #tpu.core_type<tc>, window_params = [{pipeline_mode = #tpu.pipeline_mode<synchronous>, transform_indices = @transform_0, window_bounds = array<i64: 64, 128>}, {transform_indices = @transform_1, window_bounds = array<i64: 8, 128>}]} {
    %c8_i32 = arith.constant 8 : i32
    %0 = arith.muli %arg0, %c8_i32 : i32
    %1 = tpu.assume_multiple %0, 8 : i32
    %c0_i32 = arith.constant 0 : i32
    %2 = arith.addi %1, %c0_i32 : i32
    %3 = arith.index_cast %2 : i32 to index
    %4 = memref.load %arg1[%3] : memref<32xi32, #tpu.memory_space<smem>>
    %c0_i32_0 = arith.constant 0 : i32
    %5 = tpu.memref_slice %arg2[%4, %c0_i32_0] : memref<64x128xf32, #tpu.memory_space<vmem>> -> memref<1x128xf32, #tpu.memory_space<vmem>>
    %c0_i32_1 = arith.constant 0 : i32
    %c0_i32_2 = arith.constant 0 : i32
    %6 = tpu.memref_slice %arg3[%c0_i32_1, %c0_i32_2] : memref<8x128xf32, #tpu.memory_space<vmem>> -> memref<1x128xf32, #tpu.memory_space<vmem>>
    tpu.enqueue_dma source(%5 : memref<1x128xf32, #tpu.memory_space<vmem>>) target(%6 : memref<1x128xf32, #tpu.memory_space<vmem>>) target_semaphore(%arg4 : memref<!tpu.dma_semaphore, #tpu.memory_space<semaphore_mem>>)
    %c1_i32 = arith.constant 1 : i32
    %7 = arith.addi %1, %c1_i32 : i32
    %8 = arith.index_cast %7 : i32 to index
    %9 = memref.load %arg1[%8] : memref<32xi32, #tpu.memory_space<smem>>
    %c0_i32_3 = arith.constant 0 : i32
    %10 = tpu.memref_slice %arg2[%9, %c0_i32_3] : memref<64x128xf32, #tpu.memory_space<vmem>> -> memref<1x128xf32, #tpu.memory_space<vmem>>
    %c1_i32_4 = arith.constant 1 : i32
    %c0_i32_5 = arith.constant 0 : i32
    %11 = tpu.memref_slice %arg3[%c1_i32_4, %c0_i32_5] : memref<8x128xf32, #tpu.memory_space<vmem>> -> memref<1x128xf32, #tpu.memory_space<vmem>>
    tpu.enqueue_dma source(%10 : memref<1x128xf32, #tpu.memory_space<vmem>>) target(%11 : memref<1x128xf32, #tpu.memory_space<vmem>>) target_semaphore(%arg4 : memref<!tpu.dma_semaphore, #tpu.memory_space<semaphore_mem>>)
    %c2_i32 = arith.constant 2 : i32
    %12 = arith.addi %1, %c2_i32 : i32
    %13 = arith.index_cast %12 : i32 to index
    %14 = memref.load %arg1[%13] : memref<32xi32, #tpu.memory_space<smem>>
    %c0_i32_6 = arith.constant 0 : i32
    %15 = tpu.memref_slice %arg2[%14, %c0_i32_6] : memref<64x128xf32, #tpu.memory_space<vmem>> -> memref<1x128xf32, #tpu.memory_space<vmem>>
    %c2_i32_7 = arith.constant 2 : i32
    %c0_i32_8 = arith.constant 0 : i32
    %16 = tpu.memref_slice %arg3[%c2_i32_7, %c0_i32_8] : memref<8x128xf32, #tpu.memory_space<vmem>> -> memref<1x128xf32, #tpu.memory_space<vmem>>
    tpu.enqueue_dma source(%15 : memref<1x128xf32, #tpu.memory_space<vmem>>) target(%16 : memref<1x128xf32, #tpu.memory_space<vmem>>) target_semaphore(%arg4 : memref<!tpu.dma_semaphore, #tpu.memory_space<semaphore_mem>>)
    %c3_i32 = arith.constant 3 : i32
    %17 = arith.addi %1, %c3_i32 : i32
    %18 = arith.index_cast %17 : i32 to index
    %19 = memref.load %arg1[%18] : memref<32xi32, #tpu.memory_space<smem>>
    %c0_i32_9 = arith.constant 0 : i32
    %20 = tpu.memref_slice %arg2[%19, %c0_i32_9] : memref<64x128xf32, #tpu.memory_space<vmem>> -> memref<1x128xf32, #tpu.memory_space<vmem>>
    %c3_i32_10 = arith.constant 3 : i32
    %c0_i32_11 = arith.constant 0 : i32
    %21 = tpu.memref_slice %arg3[%c3_i32_10, %c0_i32_11] : memref<8x128xf32, #tpu.memory_space<vmem>> -> memref<1x128xf32, #tpu.memory_space<vmem>>
    tpu.enqueue_dma source(%20 : memref<1x128xf32, #tpu.memory_space<vmem>>) target(%21 : memref<1x128xf32, #tpu.memory_space<vmem>>) target_semaphore(%arg4 : memref<!tpu.dma_semaphore, #tpu.memory_space<semaphore_mem>>)
    %c4_i32 = arith.constant 4 : i32
    %22 = arith.addi %1, %c4_i32 : i32
    %23 = arith.index_cast %22 : i32 to index
    %24 = memref.load %arg1[%23] : memref<32xi32, #tpu.memory_space<smem>>
    %c0_i32_12 = arith.constant 0 : i32
    %25 = tpu.memref_slice %arg2[%24, %c0_i32_12] : memref<64x128xf32, #tpu.memory_space<vmem>> -> memref<1x128xf32, #tpu.memory_space<vmem>>
    %c4_i32_13 = arith.constant 4 : i32
    %c0_i32_14 = arith.constant 0 : i32
    %26 = tpu.memref_slice %arg3[%c4_i32_13, %c0_i32_14] : memref<8x128xf32, #tpu.memory_space<vmem>> -> memref<1x128xf32, #tpu.memory_space<vmem>>
    tpu.enqueue_dma source(%25 : memref<1x128xf32, #tpu.memory_space<vmem>>) target(%26 : memref<1x128xf32, #tpu.memory_space<vmem>>) target_semaphore(%arg4 : memref<!tpu.dma_semaphore, #tpu.memory_space<semaphore_mem>>)
    %c5_i32 = arith.constant 5 : i32
    %27 = arith.addi %1, %c5_i32 : i32
    %28 = arith.index_cast %27 : i32 to index
    %29 = memref.load %arg1[%28] : memref<32xi32, #tpu.memory_space<smem>>
    %c0_i32_15 = arith.constant 0 : i32
    %30 = tpu.memref_slice %arg2[%29, %c0_i32_15] : memref<64x128xf32, #tpu.memory_space<vmem>> -> memref<1x128xf32, #tpu.memory_space<vmem>>
    %c5_i32_16 = arith.constant 5 : i32
    %c0_i32_17 = arith.constant 0 : i32
    %31 = tpu.memref_slice %arg3[%c5_i32_16, %c0_i32_17] : memref<8x128xf32, #tpu.memory_space<vmem>> -> memref<1x128xf32, #tpu.memory_space<vmem>>
    tpu.enqueue_dma source(%30 : memref<1x128xf32, #tpu.memory_space<vmem>>) target(%31 : memref<1x128xf32, #tpu.memory_space<vmem>>) target_semaphore(%arg4 : memref<!tpu.dma_semaphore, #tpu.memory_space<semaphore_mem>>)
    %c6_i32 = arith.constant 6 : i32
    %32 = arith.addi %1, %c6_i32 : i32
    %33 = arith.index_cast %32 : i32 to index
    %34 = memref.load %arg1[%33] : memref<32xi32, #tpu.memory_space<smem>>
    %c0_i32_18 = arith.constant 0 : i32
    %35 = tpu.memref_slice %arg2[%34, %c0_i32_18] : memref<64x128xf32, #tpu.memory_space<vmem>> -> memref<1x128xf32, #tpu.memory_space<vmem>>
    %c6_i32_19 = arith.constant 6 : i32
    %c0_i32_20 = arith.constant 0 : i32
    %36 = tpu.memref_slice %arg3[%c6_i32_19, %c0_i32_20] : memref<8x128xf32, #tpu.memory_space<vmem>> -> memref<1x128xf32, #tpu.memory_space<vmem>>
    tpu.enqueue_dma source(%35 : memref<1x128xf32, #tpu.memory_space<vmem>>) target(%36 : memref<1x128xf32, #tpu.memory_space<vmem>>) target_semaphore(%arg4 : memref<!tpu.dma_semaphore, #tpu.memory_space<semaphore_mem>>)
    %c7_i32 = arith.constant 7 : i32
    %37 = arith.addi %1, %c7_i32 : i32
    %38 = arith.index_cast %37 : i32 to index
    %39 = memref.load %arg1[%38] : memref<32xi32, #tpu.memory_space<smem>>
    %c0_i32_21 = arith.constant 0 : i32
    %40 = tpu.memref_slice %arg2[%39, %c0_i32_21] : memref<64x128xf32, #tpu.memory_space<vmem>> -> memref<1x128xf32, #tpu.memory_space<vmem>>
    %c7_i32_22 = arith.constant 7 : i32
    %c0_i32_23 = arith.constant 0 : i32
    %41 = tpu.memref_slice %arg3[%c7_i32_22, %c0_i32_23] : memref<8x128xf32, #tpu.memory_space<vmem>> -> memref<1x128xf32, #tpu.memory_space<vmem>>
    tpu.enqueue_dma source(%40 : memref<1x128xf32, #tpu.memory_space<vmem>>) target(%41 : memref<1x128xf32, #tpu.memory_space<vmem>>) target_semaphore(%arg4 : memref<!tpu.dma_semaphore, #tpu.memory_space<semaphore_mem>>)
    tpu.wait_dma2 semaphore(%arg4 : memref<!tpu.dma_semaphore, #tpu.memory_space<semaphore_mem>>) src(%arg3 : memref<8x128xf32, #tpu.memory_space<vmem>>) dst(%arg3 : memref<8x128xf32, #tpu.memory_space<vmem>>)
    return
  }
  func.func @transform_0(%arg0: i32, %arg1: memref<32xi32, #tpu.memory_space<smem>>) -> (i32, i32) {
    %c0_i32 = arith.constant 0 : i32
    %c0_i32_0 = arith.constant 0 : i32
    %c0_i32_1 = arith.constant 0 : i32
    return %c0_i32, %c0_i32_0 : i32, i32
  }
  func.func @transform_1(%arg0: i32, %arg1: memref<32xi32, #tpu.memory_space<smem>>) -> (i32, i32) {
    %c0_i32 = arith.constant 0 : i32
    %c0_i32_0 = arith.constant 0 : i32
    return %arg0, %c0_i32 : i32, i32
  }
}

</mosaic_0001>

<bundles_post_ra>
// kernel: tpu_custom_call.1
= control target key start
LH: loop header
LB: loop body
LE: loop exit
PB: predicated region body
PF: predicated region fallthrough
CT: control target
= control target key end

     0   :  { %s874_s9 = smov [#allocation4]   ;;  %s1023_s0 = inlined_call_operand.hbm [shape: s32[32], index: 0, kind: input, shape index: {}]   ;;  %s1024_s1 = inlined_call_operand.hbm [shape: f32[64,128], index: 1, kind: input, shape index: {}]   ;;  %s1025_s2 = inlined_call_operand.hbm [shape: f32[32,128], index: 2, kind: output, shape index: {}]  }
   0x1   :  { %8 = dma.hbm_to_smem %s1023_s0, 16, %s874_s9, [#allocation3] }
   0x2   :  { %846 = dma.done.wait [#allocation3], 16 }
   0x3   :  { %847 = vsyncadd [#allocation3], 4294967280 }
   0x4   :  { %10 = sfence }
   0x5   :  { %11 = vsyncpa [#allocation6], 0 }
   0x6   :  { %12 = vsyncpa [#allocation7], 0 }
   0x7   :  { %14 = vsyncpa [#allocation7 + $0x1], 0  ;;  %s897_s12 = smov 0   ;;  %s899_s13 = smov 0  }
   0x8   :  { %s901_s14 = smov 0   ;;  %s903_s15 = smov 0  }
   0x9 LB: > { %s918_s0 = sadd.s32 4294967295, %s872_s15   ;;  %s691_s16 = sadd.s32 4294967294, %s872_s15   ;;  %s872_s15 = sphi %s903_s15, %s1033_s15   ;;  %s868_s14 = sphi %s901_s14, %s1032_s14   ;;  %s864_s13 = sphi %s899_s13, %s1031_s13   ;;  %s860_s12 = sphi %s897_s12, %s1030_s12  }
   0xa   : > { %s922_s17 = sadd.s32 1, %s872_s15   ;;  %s48_s18 = sadd.s32 1, %s868_s14 }
   0xb   : > { %s45_s19 = ssub.s32 %s872_s15, %s922_s17  ;;  %p58_p0 = scmp.ne.s32.totalorder %s868_s14, %s864_s13 }
   0xc   : > { %p46_p1 = scmp.eq.s32.totalorder %s45_s19, 0  ;;  %p59_p2 = scmp.eq.s32.totalorder %s918_s0, 3 }
   0xd   : > { %p64_p3 = scmp.ne.s32.totalorder %s864_s13, %s860_s12  ;;  %p65_p4 = scmp.eq.s32.totalorder %s691_s16, 3 }
   0xe   : > { %s933_s20 = scalar_select %p46_p1, %s868_s14, %s48_s18  }
   0xf   : > { %p935_p5 = por %p59_p2, %p58_p0  ;;  %p939_p6 = por %p65_p4, %p64_p3 }
  0x10   : > { %p692_p7 = scmp.ge.s32.totalorder %s872_s15, 1  ;;  %p72_p8 = scmp.lt.s32.totalorder %s872_s15, 5 }
  0x11   : > { %s1027_s22 = scalar_select %p939_p6, 1, 0 }
  0x12   : > { %p731_p9 = scmp.eq.s32.totalorder %s918_s0, 0  ;;  %p946_p10 = pnand %p692_p7, %p72_p8 }
  0x13   : > { %s875_s24 = smov [#allocation5]  }
  0x14   : > { %s84_s25 = sshll.u32 %s875_s24, 4  ;;  %p723_p11 = pneg %p946_p10  ;;  %s85_s25 = int_to_ptr.vmem [resolvable:$true] %s84_s25 }
  0x15   : > { %s789_s26 = scalar_lea.vmem %s85_s25, 1024  ;;  %p797_p3 = scmp.lt.s32.totalorder %s85_s25, %s85_s25 }
  0x16   : > { %p724_p12 = pnand %p731_p9, %p723_p11  ;;  %p790_p0 = scmp.ne.s32.totalorder %s85_s25, %s789_s26 }
  0x17   : > { %p798_p4 = scmp.lt.s32.totalorder %s789_s26, %s789_s26 }
  0x18   : > { %p780_p13 = pneg %p724_p12 }
  0x19   : > { %p799_p6 = por %p798_p4, %p797_p3 }
  0x1a   : > { %p792_p1 = pnand %p790_p0, %p780_p13 }
  0x1c   : > { %p793_p2 = pneg %p792_p1 }
  0x1e   : > { %p800_p7 = pnand %p799_p6, %p793_p2 }
  0x20   : > { %803 = shalt.err (!%p800_p7)
}
  0x21   : > { %s876_s27 = smov 128   ;;  %s877_s28 = smov 8  }
  0x22   : > { %726 = dma.hbm_to_vmem [thread:$0]  (!%p724_p12), %s1024_s1, 1024, %s85_s25, [#allocation6], %s876_s27, %s876_s27, %s877_s28  }
  0x23   : > { %100 = sbr.rel (%p946_p10) target bundleno = 146 (0x92), region = 24 }
  0x28   : > { %849 = dma.done.wait (%p731_p9), [#allocation6], 1024  }
  0x29   : > { %851 = vsyncadd (%p731_p9), [#allocation6], 4294966272  ;;  %s964_s3 = sshll.u32 %s918_s0, 3  ;;  %s112_s4 = sand.u32 1, %s864_s13  }
  0x2a   : > { %s116_s5 = sld [smem:[#allocation4 + %s964_s3]]  ;;  %s696_s6 = sshll.u32 %s112_s4, 3 }
  0x2b   : > { %s970_s8 = scalar_lea.vmem [#allocation8], %s696_s6 }
  0x30   : > { %s117_s7 = scalar_lea.vmem [#allocation5], %s116_s5 }
  0x31   : > { %v136_v0 = vld [vmem:[%s117_s7] sm:$0x1] }
  0x32   : > { %137 = vst [vmem:[%s970_s8] sm:$0x1] %v136_v0 }
  0x33   : > { %163 = vsyncadd [#allocation2], 16  ;;  %s164_s9 = sadd.s32 1, %s964_s3 }
  0x34   : > { %s165_s10 = sld [smem:[#allocation4 + %s164_s9]] }
  0x3a   : > { %s166_s11 = scalar_lea.vmem [#allocation5], %s165_s10 }
  0x3b   : > { %v186_v1 = vld [vmem:[%s166_s11] sm:$0x1] }
  0x3c   : > { %699 = vst [vmem:[%s970_s8 + $0x1] sm:$0x1] %v186_v1 }
  0x3d   : > { %213 = vsyncadd [#allocation2], 16  ;;  %s214_s16 = sadd.s32 2, %s964_s3 }
  0x3e   : > { %s215_s18 = sld [smem:[#allocation4 + %s214_s16]] }
  0x44   : > { %s216_s19 = scalar_lea.vmem [#allocation5], %s215_s18 }
  0x45   : > { %v236_v2 = vld [vmem:[%s216_s19] sm:$0x1] }
  0x46   : > { %701 = vst [vmem:[%s970_s8 + $0x2] sm:$0x1] %v236_v2 }
  0x47   : > { %263 = vsyncadd [#allocation2], 16  ;;  %s264_s23 = sadd.s32 3, %s964_s3 }
  0x48   : > { %s265_s24 = sld [smem:[#allocation4 + %s264_s23]] }
  0x4e   : > { %s266_s25 = scalar_lea.vmem [#allocation5], %s265_s24 }
  0x4f   : > { %v286_v3 = vld [vmem:[%s266_s25] sm:$0x1] }
  0x50   : > { %703 = vst [vmem:[%s970_s8 + $0x3] sm:$0x1] %v286_v3 }
  0x51   : > { %313 = vsyncadd [#allocation2], 16  ;;  %s314_s26 = sadd.s32 4, %s964_s3 }
  0x52   : > { %s315_s27 = sld [smem:[#allocation4 + %s314_s26]] }
  0x58   : > { %s316_s28 = scalar_lea.vmem [#allocation5], %s315_s27 }
  0x59   : > { %v336_v4 = vld [vmem:[%s316_s28] sm:$0x1] }
  0x5a   : > { %705 = vst [vmem:[%s970_s8 + $0x4] sm:$0x1] %v336_v4 }
  0x5b   : > { %363 = vsyncadd [#allocation2], 16  ;;  %s364_s29 = sadd.s32 5, %s964_s3 }
  0x5c   : > { %s365_s30 = sld [smem:[#allocation4 + %s364_s29]] }
  0x62   : > { %s366_s5 = scalar_lea.vmem [#allocation5], %s365_s30 }
  0x63   : > { %v386_v5 = vld [vmem:[%s366_s5] sm:$0x1] }
  0x64   : > { %707 = vst [vmem:[%s970_s8 + $0x5] sm:$0x1] %v386_v5 }
  0x65   : > { %413 = vsyncadd [#allocation2], 16  ;;  %s414_s6 = sadd.s32 6, %s964_s3 }
  0x66   : > { %s415_s7 = sld [smem:[#allocation4 + %s414_s6]] }
  0x6c   : > { %s416_s9 = scalar_lea.vmem [#allocation5], %s415_s7 }
  0x6d   : > { %v436_v6 = vld [vmem:[%s416_s9] sm:$0x1] }
  0x6e   : > { %709 = vst [vmem:[%s970_s8 + $0x6] sm:$0x1] %v436_v6 }
  0x6f   : > { %463 = vsyncadd [#allocation2], 16  ;;  %s464_s10 = sadd.s32 7, %s964_s3 }
  0x70   : > { %s465_s11 = sld [smem:[#allocation4 + %s464_s10]] }
  0x76   : > { %s466_s16 = scalar_lea.vmem [#allocation5], %s465_s11 }
  0x77   : > { %v486_v7 = vld [vmem:[%s466_s16] sm:$0x1] }
  0x78   : > { %711 = vst [vmem:[%s970_s8 + $0x7] sm:$0x1] %v486_v7 }
  0x79   : > { %513 = vsyncadd [#allocation2], 16 }
  0x7a   : > { %852 = dma.done.wait [#allocation2], 128 }
  0x7b   : > { %853 = vsyncadd [#allocation2], 4294967168  ;;  %s713_s18 = sshll.u32 %s918_s0, 7  ;;  %s531_s25 = sshll.u32 %s970_s8, 4  ;;  %s532_s25 = int_to_ptr.vmem [resolvable:$true] %s531_s25 }
  0x7c   : > { %s529_s24 = scalar_lea.hbm %s1025_s2, %s713_s18  ;;  %s518_s3 = scalar_lea.sflag [#allocation7], %s112_s4 }
  0x7d   : > { %s804_s26 = scalar_lea.vmem %s532_s25, 128  ;;  %s878_s27 = smov [#allocation8]  }
  0x7e   : > { %p805_p6 = scmp.ne.s32.totalorder %s532_s25, %s804_s26  ;;  %s808_s28 = sshll.u32 %s878_s27, 4  ;;  %s809_s28 = int_to_ptr.vmem [resolvable:$false] %s808_s28 }
  0x7f   : > { %s810_s29 = scalar_lea.vmem %s809_s28, 256  ;;  %p811_p10 = scmp.lt.s32.totalorder %s532_s25, %s809_s28 }
  0x80   : > { %p806_p8 = pnand %p805_p6, %p935_p5  ;;  %p812_p11 = scmp.lt.s32.totalorder %s810_s29, %s804_s26 }
  0x82   : > { %p807_p9 = pneg %p806_p8  ;;  %p813_p12 = por %p812_p11, %p811_p10 }
  0x84   : > { %p814_p13 = pnand %p813_p12, %p807_p9 }
  0x86   : > { %817 = shalt.err (!%p814_p13)
}
  0x87   : > { %s818_s0 = scalar_lea.hbm %s529_s24, 128  ;;  %s822_s30 = scalar_lea.hbm %s1025_s2, 512 }
  0x88   : > { %p819_p0 = scmp.ne.s32.totalorder %s529_s24, %s818_s0  ;;  %p823_p3 = scmp.lt.s32.totalorder %s529_s24, %s1025_s2 }
  0x89   : > { %p824_p4 = scmp.lt.s32.totalorder %s822_s30, %s818_s0 }
  0x8a   : > { %p820_p1 = pnand %p819_p0, %p935_p5 }
  0x8b   : > { %p825_p7 = por %p824_p4, %p823_p3 }
  0x8c   : > { %p821_p2 = pneg %p820_p1 }
  0x8e   : > { %p826_p6 = pnand %p825_p7, %p821_p2 }
  0x90   : > { %829 = shalt.err (!%p826_p6)
}
  0x91   : > { %721 = dma.vmem_to_hbm [thread:$0]  (%p935_p5), %s532_s25, 128, %s529_s24, %s518_s3  }
  0x92 PF: > { %p733_p8 = scmp.ge.s32.totalorder %s872_s15, 2  ;;  %s543_s7 = sand.u32 1, %s860_s12  }
  0x93   : > { %p1029_p9 = scmp.ne.s32.totalorder %s1027_s22, 0  ;;  %s544_s9 = scalar_lea.sflag [#allocation7], %s543_s7 }
  0x95   : > { %p728_p10 = pnand %p733_p8, %p1029_p9 }
  0x97   : > { %p729_p11 = pneg %p728_p10 }
  0x99   : > { %855 = dma.done.wait (%p729_p11), %s544_s9, 128  }
  0x9a   : > { %857 = vsyncadd (%p729_p11), %s544_s9, 4294967168  ;;  %p17_p12 = scmp.ge.s32.totalorder %s922_s17, 6   ;;  %s1030_s12 = smov %s864_s13 }
  0x9b   : > { %s1031_s13 = smov %s868_s14  ;;  %s1032_s14 = smov %s933_s20 }
  0x9c   : > { %s1033_s15 = smov %s922_s17  ;;  %19 = sbr.rel (!%p17_p12) target bundleno = 9 (0x9), region = 396 }
  0xa1   :  { %549 = vsyncpa [#allocation6], 1 }
  0xa2   :  { %551 = vsyncpa [#allocation6 + $0x1], 1 }
  0xa3   :  { %552 = vsyncpa [#allocation7], 1 }
  0xa4   :  { %554 = vsyncpa [#allocation7 + $0x1], 1 }
  0xa5   :  { %555 = vsyncmov [#allocation2] }
  0xa8   :  { %s556_s15 = vpop.sfrf %555 }
  0xa9   :  { %p716_p5 = scmp.ne.s32.totalorder %s556_s15, 0 }
  0xab   :  { %560 = shalt.err (%p716_p5)  }

</bundles_post_ra>
